<compile_context>
chip_gen: v7x
topology: tpu7x:2x2x1
jax: 0.10.0
libtpu: 0.0.40
codegen_flags: <defaults>
</compile_context>

<pallas_src>
import functools

import jax
import jax.numpy as jnp
from jax.experimental import pallas as pl
from jax.experimental.pallas import tpu as pltpu

hierarchy_map = {0: [0, 1], 1: [2, 3, 4, 5, 6, 7, 8], 2: [9, 10, 11, 12, 13], 3: [14, 15]}

FINE = 0
COARSE = 1
LEVEL_PAD = 2   # sentinel level for padded rows -> contributes zero loss


def _round_up(x, m):
    return ((x + m - 1) // m) * m


def _hier_xent_kernel(logits_ref, tl_ref, sub2sup_ref, out_ref, acc_ref, *, inv_n):
    """Layout: logits (C_pad, TN) classes-on-sublanes / batch-on-lanes; tl (2, TN);
    sub2sup (C_pad, 1); out (1, 8, 128); acc (1, 1) f32."""
    i = pl.program_id(1)          # reduction ("arbitrary") axis over batch tiles

    @pl.when(i == 0)
    def _():
        acc_ref[...] = jnp.zeros_like(acc_ref)

    logits = logits_ref[...].astype(jnp.float32)          # (C_pad, TN), cast in-kernel
    c, tn = logits.shape

    targets = tl_ref[0:1, :]                              # (1, TN) int32
    levels = tl_ref[1:2, :]                               # (1, TN) int32
    sub2sup = sub2sup_ref[...]                            # (C_pad, 1) int32

    # log-softmax pieces kept in log-space; class reduction is over sublanes (axis 0)
    row_max = jnp.max(logits, axis=0, keepdims=True)      # (1, TN)
    e = jnp.exp(logits - row_max)                         # (C_pad, TN)
    denom = jnp.sum(e, axis=0, keepdims=True)             # (1, TN)
    lse = jnp.log(denom)                                  # (1, TN)

    class_ids = jax.lax.broadcasted_iota(jnp.int32, (c, 1), 0)   # (C_pad, 1)

    # fine:   -log p[t] = (lse + row_max) - logits[t]   (from pre-shift logits)
    fine_sel = jnp.sum(jnp.where(class_ids == targets, logits, 0.0),
                       axis=0, keepdims=True)             # (1, TN)
    fine_loss = (lse + row_max) - fine_sel

    # coarse: -log( sum_{sub in super t} p_sub + 1e-8 )
    #       == lse - log( sum_{sub} exp(logit_sub - row_max) + 1e-8 * denom )
    coarse_sum = jnp.sum(jnp.where(sub2sup == targets, e, 0.0),
                         axis=0, keepdims=True)           # (1, TN)
    coarse_loss = lse - jnp.log(coarse_sum + 1e-8 * denom)

    per_sample = jnp.where(levels == FINE, fine_loss,
                           jnp.where(levels == COARSE, coarse_loss, 0.0))   # (1, TN)

    acc_ref[...] += jnp.sum(per_sample, axis=1, keepdims=True)              # (1, 1)

    @pl.when(i == pl.num_programs(1) - 1)
    def _():
        val = (acc_ref[...] * jnp.float32(inv_n)).reshape(1, 1, 1)
        out_ref[...] = jnp.broadcast_to(val, (1, 8, 128))


def _choose_tn(n, c_pad, itemsize, block_cols, num_splits):
    # per-lane-column working set: double-buffered native input + ~6 f32 temporaries
    bytes_per_col = c_pad * (2 * itemsize + 6 * 4)
    budget = 24 << 20          # keep per-core working set well inside v7x's 64 MiB VMEM
    tn_budget = max(128, (budget // bytes_per_col) // 128 * 128)
    per_split = _round_up(-(-n // num_splits), 128)       # ceil(n/num_splits) -> x128
    return max(128, min(block_cols, per_split, tn_budget))


def hierarchical_cross_entropy_loss(logits, remapped_targets, label_level_ids,
                                    sub_to_super_vec, *, block_cols=32768,
                                    num_splits=2):
    """logits: (N, C) float (f32 or bf16); remapped_targets: (N,) int;
    label_level_ids: (N,) int (0=fine, 1=coarse); sub_to_super_vec: (C,) int."""
    assert block_cols % 128 == 0, "block_cols must be a multiple of 128 (lane tiling)"
    n, c = logits.shape
    itemsize = jnp.dtype(logits.dtype).itemsize
    sublane = {4: 8, 2: 16, 1: 32}.get(itemsize, 8)
    c_pad = _round_up(c, sublane)

    # ---- lane-dense layout: classes on sublanes, batch on lanes -------------------
    logits_t = logits.T                                    # (C, N), native dtype
    if c_pad != c:
        # pad classes with a huge negative logit (exp -> 0, never the row max winner)
        logits_t = jnp.pad(logits_t, ((0, c_pad - c), (0, 0)), constant_values=-1e30)

    tn = _choose_tn(n, c_pad, itemsize, block_cols, num_splits)
    n_pad = _round_up(n, tn * num_splits)
    tiles_per_split = n_pad // (tn * num_splits)

    # targets + levels as one lane-dense (2, N) int32 stream
    tl = jnp.stack([remapped_targets.astype(jnp.int32),
                    label_level_ids.astype(jnp.int32)], axis=0)

    if n_pad != n:
        logits_t = jnp.pad(logits_t, ((0, 0), (0, n_pad - n)))
        tl = jnp.pad(tl, ((0, 0), (0, n_pad - n)), constant_values=LEVEL_PAD)

    sub2sup = sub_to_super_vec.astype(jnp.int32)
    if c_pad != c:
        sub2sup = jnp.pad(sub2sup, (0, c_pad - c), constant_values=-1)  # never matches
    sub2sup2d = sub2sup.reshape(c_pad, 1)

    kernel = functools.partial(_hier_xent_kernel, inv_n=1.0 / float(n))

    # explicit scoped-VMEM budget (v5e default is only 16 MiB); working-set estimate:
    working = (2 * c_pad * tn * itemsize          # double-buffered logits tile
               + 2 * 2 * tn * 4                   # double-buffered targets+levels
               + 2 * c_pad * 4                    # sub->super
               + 6 * c_pad * tn * 4)              # in-kernel f32 temporaries
    vmem_limit = int(min(max(32 << 20, int(1.5 * working)), 48 << 20))

    T = tiles_per_split
    out = pl.pallas_call(
        kernel,
        out_shape=jax.ShapeDtypeStruct((num_splits, 8, 128), jnp.float32),
        grid=(num_splits, tiles_per_split),
        in_specs=[
            pl.BlockSpec((c_pad, tn), lambda p, i: (0, p * T + i)),   # logits tile
            pl.BlockSpec((2, tn), lambda p, i: (0, p * T + i)),       # targets+levels
            pl.BlockSpec((c_pad, 1), lambda p, i: (0, 0)),            # sub->super
        ],
        out_specs=pl.BlockSpec((1, 8, 128), lambda p, i: (p, 0, 0)),  # per-split partial
        scratch_shapes=[pltpu.VMEM((1, 1), jnp.float32)],
        compiler_params=pltpu.CompilerParams(
            dimension_semantics=("parallel", "arbitrary"),
            vmem_limit_bytes=vmem_limit),
        cost_estimate=pl.CostEstimate(
            flops=12 * n_pad * c_pad,
            transcendentals=n_pad * c_pad + 4 * n_pad,
            bytes_accessed=n_pad * c_pad * itemsize + 2 * n_pad * 4 + c_pad * 4
                           + num_splits * 8 * 128 * 4),
    )(logits_t, tl, sub2sup2d)

    return jnp.sum(out[:, 0, 0])     # sum the per-split partials (already scaled by 1/N)


def _reference_loss(logits, targets, level_ids, sub_to_super_vec):
    """Vectorized pure-JAX reference mirroring the PyTorch forward."""
    logits = logits.astype(jnp.float32)
    logp = jax.nn.log_softmax(logits, axis=1)
    n = logits.shape[0]
    fine = -logp[jnp.arange(n), targets]
    probs = jnp.exp(logp)
    mask = sub_to_super_vec[None, :] == targets[:, None]
    coarse = -jnp.log(jnp.sum(jnp.where(mask, probs, 0.0), axis=1) + 1e-8)
    per = jnp.where(level_ids == FINE, fine, coarse)
    return jnp.sum(per) / n


def _build_sub_to_super(hmap, num_fine):
    s2s = [0] * num_fine
    for super_cls, sub_classes in hmap.items():
        for sub_cls in sub_classes:
            s2s[sub_cls] = super_cls
    return jnp.array(s2s, dtype=jnp.int32)


if __name__ == "__main__":
    key = jax.random.PRNGKey(0)
    num_fine = max(c for subs in hierarchy_map.values() for c in subs) + 1   # 16
    sub_to_super_vec = _build_sub_to_super(hierarchy_map, num_fine)

    k1, k2, k3 = jax.random.split(key, 3)

    # --- test 1: small batch, f32 --------------------------------------------------
    batch = 8
    logits = jax.random.normal(k1, (batch, num_fine), dtype=jnp.float32) * 2.0
    level_ids = jnp.array([FINE, COARSE, FINE, COARSE, FINE, COARSE, COARSE, FINE],
                          dtype=jnp.int32)
    targets = jnp.array([3, 1, 15, 0, 7, 2, 3, 10], dtype=jnp.int32)

    loss = hierarchical_cross_entropy_loss(logits, targets, level_ids, sub_to_super_vec)
    loss = jax.block_until_ready(loss)
    ref = _reference_loss(logits, targets, level_ids, sub_to_super_vec)
    assert jnp.allclose(loss, ref, rtol=1e-4, atol=1e-4), (loss, ref)

    # --- test 2: multi-tile grid, 2-way split, row padding (N=300, tn=128) ---------
    batch2 = 300
    logits2 = jax.random.normal(k2, (batch2, num_fine), dtype=jnp.float32) * 2.0
    idx2 = jnp.arange(batch2)
    level_ids2 = jnp.where(idx2 % 2 == 0, FINE, COARSE).astype(jnp.int32)
    targets2 = jnp.where(level_ids2 == FINE, (idx2 * 3) % num_fine, idx2 % 4).astype(jnp.int32)

    loss2 = hierarchical_cross_entropy_loss(logits2, targets2, level_ids2,
                                            sub_to_super_vec, block_cols=128)
    loss2 = jax.block_until_ready(loss2)
    ref2 = _reference_loss(logits2, targets2, level_ids2, sub_to_super_vec)
    assert jnp.allclose(loss2, ref2, rtol=1e-4, atol=1e-4), (loss2, ref2)

    # --- test 3: bf16 logits streamed in native dtype ------------------------------
    logits_bf16 = logits2.astype(jnp.bfloat16)
    loss3 = hierarchical_cross_entropy_loss(logits_bf16, targets2, level_ids2,
                                            sub_to_super_vec, block_cols=128)
    loss3 = jax.block_until_ready(loss3)
    ref3 = _reference_loss(logits_bf16.astype(jnp.float32), targets2, level_ids2,
                           sub_to_super_vec)
    assert jnp.allclose(loss3, ref3, rtol=1e-3, atol=1e-3), (loss3, ref3)

    # --- test 4: odd class count (C=13) exercises class-axis padding ----------------
    hmap4 = {0: [0, 1, 2], 1: [3, 4, 5, 6], 2: [7, 8, 9], 3: [10, 11, 12]}
    c4 = 13
    s2s4 = _build_sub_to_super(hmap4, c4)
    batch4 = 21
    logits4 = jax.random.normal(k3, (batch4, c4), dtype=jnp.float32) * 2.0
    idx4 = jnp.arange(batch4)
    level_ids4 = jnp.where(idx4 % 3 == 0, COARSE, FINE).astype(jnp.int32)
    targets4 = jnp.where(level_ids4 == FINE, (idx4 * 5) % c4, idx4 % 4).astype(jnp.int32)

    loss4 = hierarchical_cross_entropy_loss(logits4, targets4, level_ids4, s2s4,
                                            block_cols=128)
    loss4 = jax.block_until_ready(loss4)
    ref4 = _reference_loss(logits4, targets4, level_ids4, s2s4)
    assert jnp.allclose(loss4, ref4, rtol=1e-4, atol=1e-4), (loss4, ref4)

    print("KERNEL_OK")
</pallas_src>

<mosaic_0001>
module attributes {stable_mosaic.version = 11 : i64} {
  func.func @_hier_xent_kernel(%arg0: i32, %arg1: i32, %arg2: memref<16x128xf32, #tpu.memory_space<vmem>>, %arg3: memref<2x128xi32, #tpu.memory_space<vmem>>, %arg4: memref<16x1xi32, #tpu.memory_space<vmem>>, %arg5: memref<1x8x128xf32, #tpu.memory_space<vmem>>, %arg6: memref<1x1xf32, #tpu.memory_space<vmem>>) attributes {dimension_semantics = [#tpu.dimension_semantics<parallel>, #tpu.dimension_semantics<arbitrary>], iteration_bounds = array<i64: 2, 1>, scalar_prefetch = 0 : i64, scratch_operands = 1 : i64, tpu.core_type = #tpu.core_type<tc>, window_params = [{transform_indices = @transform_0, window_bounds = array<i64: 16, 128>}, {transform_indices = @transform_1, window_bounds = array<i64: 2, 128>}, {pipeline_mode = #tpu.pipeline_mode<synchronous>, transform_indices = @transform_2, window_bounds = array<i64: 16, 1>}, {transform_indices = @transform_3, window_bounds = array<i64: 1, 8, 128>}]} {
    %c0_i32 = arith.constant 0 : i32
    %0 = arith.cmpi eq, %arg1, %c0_i32 : i32
    %1 = arith.extui %0 : i1 to i32
    %c0_i32_0 = arith.constant 0 : i32
    %2 = arith.cmpi ne, %1, %c0_i32_0 : i32
    scf.if %2 {
      %cst_22 = arith.constant 0.000000e+00 : f32
      %52 = vector.broadcast %cst_22 : f32 to vector<1x1xf32>
      %c0_23 = arith.constant 0 : index
      %c0_24 = arith.constant 0 : index
      %53 = vector.load %arg6[%c0_23, %c0_24] : memref<1x1xf32, #tpu.memory_space<vmem>>, vector<1x1xf32>
      tpu.vector_store %arg6[%c0_23, %c0_24], %52 {strides = array<i32>} : memref<1x1xf32, #tpu.memory_space<vmem>>, vector<1x1xf32>,
    } else {
    }
    %c0 = arith.constant 0 : index
    %c0_1 = arith.constant 0 : index
    %3 = vector.load %arg2[%c0, %c0_1] : memref<16x128xf32, #tpu.memory_space<vmem>>, vector<16x128xf32>
    %c0_2 = arith.constant 0 : index
    %c0_3 = arith.constant 0 : index
    %4 = vector.load %arg3[%c0_2, %c0_3] : memref<2x128xi32, #tpu.memory_space<vmem>>, vector<1x128xi32>
    %c1 = arith.constant 1 : index
    %c0_4 = arith.constant 0 : index
    %5 = vector.load %arg3[%c1, %c0_4] : memref<2x128xi32, #tpu.memory_space<vmem>>, vector<1x128xi32>
    %c0_5 = arith.constant 0 : index
    %c0_6 = arith.constant 0 : index
    %6 = vector.load %arg4[%c0_5, %c0_6] : memref<16x1xi32, #tpu.memory_space<vmem>>, vector<16x1xi32>
    %cst = arith.constant dense<0xFF800000> : vector<128xf32>
    %7 = vector.multi_reduction <maximumf>, %3, %cst [0] : vector<16x128xf32> to vector<128xf32>
    %8 = vector.shape_cast %7 : vector<128xf32> to vector<1x128xf32>
    %9 = vector.broadcast %8 : vector<1x128xf32> to vector<16x128xf32>
    %10 = arith.subf %3, %9 : vector<16x128xf32>
    %11 = math.exp %10 : vector<16x128xf32>
    %cst_7 = arith.constant dense<0.000000e+00> : vector<128xf32>
    %12 = vector.multi_reduction <add>, %11, %cst_7 [0] : vector<16x128xf32> to vector<128xf32>
    %13 = vector.shape_cast %12 : vector<128xf32> to vector<1x128xf32>
    %14 = math.log %13 : vector<1x128xf32>
    %15 = tpu.iota {dimensions = array<i32: 0>} : vector<16x1xi32>
    %16 = vector.broadcast %15 : vector<16x1xi32> to vector<16x128xi32>
    %17 = vector.broadcast %4 : vector<1x128xi32> to vector<16x128xi32>
    %18 = arith.cmpi eq, %16, %17 : vector<16x128xi32>
    %cst_8 = arith.constant 0.000000e+00 : f32
    %19 = vector.broadcast %cst_8 : f32 to vector<16x128xf32>
    %20 = arith.select %18, %3, %19 : vector<16x128xi1>, vector<16x128xf32>
    %cst_9 = arith.constant dense<0.000000e+00> : vector<128xf32>
    %21 = vector.multi_reduction <add>, %20, %cst_9 [0] : vector<16x128xf32> to vector<128xf32>
    %22 = vector.shape_cast %21 : vector<128xf32> to vector<1x128xf32>
    %23 = arith.addf %14, %8 : vector<1x128xf32>
    %24 = arith.subf %23, %22 : vector<1x128xf32>
    %25 = vector.broadcast %6 : vector<16x1xi32> to vector<16x128xi32>
    %26 = vector.broadcast %4 : vector<1x128xi32> to vector<16x128xi32>
    %27 = arith.cmpi eq, %25, %26 : vector<16x128xi32>
    %cst_10 = arith.constant 0.000000e+00 : f32
    %28 = vector.broadcast %cst_10 : f32 to vector<16x128xf32>
    %29 = arith.select %27, %11, %28 : vector<16x128xi1>, vector<16x128xf32>
    %cst_11 = arith.constant dense<0.000000e+00> : vector<128xf32>
    %30 = vector.multi_reduction <add>, %29, %cst_11 [0] : vector<16x128xf32> to vector<128xf32>
    %31 = vector.shape_cast %30 : vector<128xf32> to vector<1x128xf32>
    %cst_12 = arith.constant 9.99999993E-9 : f32
    %32 = vector.broadcast %cst_12 : f32 to vector<1x128xf32>
    %33 = arith.mulf %32, %13 : vector<1x128xf32>
    %34 = arith.addf %31, %33 : vector<1x128xf32>
    %35 = math.log %34 : vector<1x128xf32>
    %36 = arith.subf %14, %35 : vector<1x128xf32>
    %c0_i32_13 = arith.constant 0 : i32
    %37 = vector.broadcast %c0_i32_13 : i32 to vector<1x128xi32>
    %38 = arith.cmpi eq, %5, %37 : vector<1x128xi32>
    %c1_i32 = arith.constant 1 : i32
    %39 = vector.broadcast %c1_i32 : i32 to vector<1x128xi32>
    %40 = arith.cmpi eq, %5, %39 : vector<1x128xi32>
    %cst_14 = arith.constant 0.000000e+00 : f32
    %41 = vector.broadcast %cst_14 : f32 to vector<1x128xf32>
    %42 = arith.select %40, %36, %41 : vector<1x128xi1>, vector<1x128xf32>
    %43 = arith.select %38, %24, %42 : vector<1x128xi1>, vector<1x128xf32>
    %c0_15 = arith.constant 0 : index
    %c0_16 = arith.constant 0 : index
    %44 = vector.load %arg6[%c0_15, %c0_16] : memref<1x1xf32, #tpu.memory_space<vmem>>, vector<1x1xf32>
    %cst_17 = arith.constant dense<0.000000e+00> : vector<1xf32>
    %45 = vector.multi_reduction <add>, %43, %cst_17 [1] : vector<1x128xf32> to vector<1xf32>
    %46 = vector.shape_cast %45 : vector<1xf32> to vector<1x1xf32>
    %47 = arith.addf %44, %46 : vector<1x1xf32>
    %c0_18 = arith.constant 0 : index
    %c0_19 = arith.constant 0 : index
    %48 = vector.load %arg6[%c0_18, %c0_19] : memref<1x1xf32, #tpu.memory_space<vmem>>, vector<1x1xf32>
    tpu.vector_store %arg6[%c0_18, %c0_19], %47 {strides = array<i32>} : memref<1x1xf32, #tpu.memory_space<vmem>>, vector<1x1xf32>,
    %c0_i32_20 = arith.constant 0 : i32
    %49 = arith.cmpi eq, %arg1, %c0_i32_20 : i32
    %50 = arith.extui %49 : i1 to i32
    %c0_i32_21 = arith.constant 0 : i32
    %51 = arith.cmpi ne, %50, %c0_i32_21 : i32
    scf.if %51 {
      %c0_22 = arith.constant 0 : index
      %c0_23 = arith.constant 0 : index
      %52 = vector.load %arg6[%c0_22, %c0_23] : memref<1x1xf32, #tpu.memory_space<vmem>>, vector<1x1xf32>
      %cst_24 = arith.constant 1.250000e-01 : f32
      %53 = vector.broadcast %cst_24 : f32 to vector<1x1xf32>
      %54 = arith.mulf %52, %53 : vector<1x1xf32>
      %55 = vector.shape_cast %54 : vector<1x1xf32> to vector<1x1x1xf32>
      %56 = vector.shape_cast %55 : vector<1x1x1xf32> to vector<1x1x1xf32>
      %57 = vector.broadcast %56 : vector<1x1x1xf32> to vector<1x8x128xf32>
      %c0_25 = arith.constant 0 : index
      %c0_26 = arith.constant 0 : index
      %c0_27 = arith.constant 0 : index
      %58 = vector.load %arg5[%c0_25, %c0_26, %c0_27] : memref<1x8x128xf32, #tpu.memory_space<vmem>>, vector<1x8x128xf32>
      tpu.vector_store %arg5[%c0_25, %c0_26, %c0_27], %57 {strides = array<i32>} : memref<1x8x128xf32, #tpu.memory_space<vmem>>, vector<1x8x128xf32>,
    } else {
    }
    return
  }
  func.func @transform_0(%arg0: i32, %arg1: i32) -> (i32, i32) {
    %c1_i32 = arith.constant 1 : i32
    %0 = arith.muli %arg0, %c1_i32 : i32
    %1 = arith.addi %0, %arg1 : i32
    %c0_i32 = arith.constant 0 : i32
    %c0_i32_0 = arith.constant 0 : i32
    return %c0_i32, %1 : i32, i32
  }
  func.func @transform_1(%arg0: i32, %arg1: i32) -> (i32, i32) {
    %c1_i32 = arith.constant 1 : i32
    %0 = arith.muli %arg0, %c1_i32 : i32
    %1 = arith.addi %0, %arg1 : i32
    %c0_i32 = arith.constant 0 : i32
    %c0_i32_0 = arith.constant 0 : i32
    return %c0_i32, %1 : i32, i32
  }
  func.func @transform_2(%arg0: i32, %arg1: i32) -> (i32, i32) {
    %c0_i32 = arith.constant 0 : i32
    %c0_i32_0 = arith.constant 0 : i32
    %c0_i32_1 = arith.constant 0 : i32
    return %c0_i32, %c0_i32_0 : i32, i32
  }
  func.func @transform_3(%arg0: i32, %arg1: i32) -> (i32, i32, i32) {
    %c0_i32 = arith.constant 0 : i32
    %c0_i32_0 = arith.constant 0 : i32
    %c0_i32_1 = arith.constant 0 : i32
    return %arg0, %c0_i32, %c0_i32_0 : i32, i32, i32
  }
}

</mosaic_0001>

<bundles_post_ra>
// kernel: tpu_custom_call.1
= control target key start
LH: loop header
LB: loop body
LE: loop exit
PB: predicated region body
PF: predicated region fallthrough
CT: control target
= control target key end

     0   :  { %8 = vsyncpa [#allocation4], 0  ;;  %s858_s0 = inlined_call_operand.hbm [shape: f32[16,256], index: 0, kind: input, shape index: {}]   ;;  %s859_s1 = inlined_call_operand.vmem [shape: s32[2,256], index: 1, kind: input, shape index: {}]   ;;  %s860_s2 = inlined_call_operand.vmem [shape: s32[16,1], index: 2, kind: input, shape index: {}]   ;;  %s861_s3 = inlined_call_operand.hbm [shape: f32[2,8,128], index: 3, kind: output, shape index: {}]  }
   0x1   :  { %10 = vsyncpa [#allocation4 + $0x1], 0 }
   0x2   :  { %11 = vsyncpa [#allocation5], 0 }
   0x3   :  { %13 = vsyncpa [#allocation5 + $0x1], 0  ;;  %s669_s12 = smov 0   ;;  %s671_s13 = smov 0  }
   0x4   :  { %s673_s14 = smov 0   ;;  %s675_s15 = smov 0  }
   0x5   :  { %s677_s16 = smov 0   ;;  %s679_s17 = smov 0  }
   0x6 LB: > { %s436_s18 = sadd.s32 4294967295, %s640_s17   ;;  %s437_s19 = sadd.s32 4294967294, %s640_s17   ;;  %s640_s17 = sphi %s679_s17, %s19_s17   ;;  %s636_s16 = sphi %s677_s16, %s875_s16   ;;  %s632_s15 = sphi %s675_s15, %s874_s15   ;;  %s628_s14 = sphi %s673_s14, %s873_s14   ;;  %s624_s13 = sphi %s671_s13, %s872_s13   ;;  %s620_s12 = sphi %s669_s12, %s871_s12  }
   0x7   : > { %s31_s20 = sadd.s32 1, %s636_s16  ;;  %s40_s21 = sadd.s32 1, %s628_s14 }
   0x8   : > { %p33_p0 = scmp.ge.s32.totalorder %s31_s20, 2  ;;  %p47_p1 = scmp.ne.s32.totalorder %s628_s14, %s624_s13 }
   0x9   : > { %p48_p2 = scmp.eq.s32.totalorder %s640_s17, 0  ;;  %p53_p3 = scmp.ne.s32.totalorder %s624_s13, %s620_s12 }
   0xa   : > { %s877_s20 = smov (%p33_p0, %s31_s20), 0  ;;  %p54_p5 = scmp.eq.s32.totalorder %s436_s18, 0 }
   0xb   : > { %p710_p4 = por %p48_p2, %p47_p1  ;;  %s37_s23 = ssub.s32 %s636_s16, %s877_s20 }
   0xc   : > { %p126_p6 = scmp.eq.s32.totalorder %s436_s18, 1  ;;  %p38_p7 = scmp.eq.s32.totalorder %s37_s23, 0 }
   0xd   : > { %p716_p8 = por %p54_p5, %p53_p3  ;;  %p132_p10 = scmp.eq.s32.totalorder %s437_s19, 1 }
   0xe   : > { %p720_p9 = por %p126_p6, %p47_p1  ;;  %p463_p13 = scmp.lt.s32.totalorder %s640_s17, 2 }
   0xf   : > { %s725_s26 = scalar_select %p38_p7, %s628_s14, %s40_s21  }
  0x10   : > { %s865_s25 = scalar_select %p720_p9, 1, 0 }
  0x11   : > { %p727_p11 = por %p132_p10, %p53_p3  ;;  %s155_s28 = sand.u32 1, %s628_s14  }
  0x12   : > { %s440_s29 = sshll.u32 %s155_s28, 4  ;;  %s441_s30 = sshll.u32 %s636_s16, 7 }
  0x13   : > { %s866_s27 = scalar_select %p727_p11, 1, 0 }
  0x14   : > { %s738_s6 = scalar_lea.hbm %s858_s0, %s441_s30  ;;  %s159_s7 = scalar_lea.vmem [#allocation3], %s440_s29 }
  0x15   : > { %s166_s8 = sshll.u32 %s159_s7, 4  ;;  %p744_p0 = pnand %p463_p13, %p710_p4  ;;  %s740_s8 = int_to_ptr.vmem [resolvable:$true] %s166_s8 }
  0x16   : > { %s748_s10 = scalar_lea.sflag [#allocation4], %s155_s28  ;;  %s528_s11 = scalar_lea.hbm %s738_s6, 256 }
  0x17   : > { %p529_p1 = scmp.ne.s32.totalorder %s738_s6, %s528_s11  ;;  %p530_p2 = pneg %p744_p0 }
  0x18   : > { %s533_s21 = scalar_lea.hbm %s858_s0, 512  ;;  %p534_p4 = scmp.lt.u32.totalorder %s738_s6, %s858_s0 }
  0x19   : > { %p531_p3 = pnand %p530_p2, %p529_p1  ;;  %p535_p6 = scmp.lt.u32.totalorder %s533_s21, %s528_s11 }
  0x1a   : > { %p537_p10 = scmp.lt.u32.totalorder %s528_s11, %s738_s6 }
  0x1b   : > { %p532_p5 = pneg %p531_p3  ;;  %p536_p7 = por %p535_p6, %p534_p4 }
  0x1d   : > { %p538_p13 = por %p537_p10, %p536_p7 }
  0x1f   : > { %p539_p12 = pnand %p538_p13, %p532_p5 }
  0x21   : > { %542 = shalt.err (!%p539_p12)
}
  0x22   : > { %s543_s28 = scalar_lea.vmem %s740_s8, 256  ;;  %s642_s29 = smov [#allocation3]  }
  0x23   : > { %p544_p1 = scmp.ne.s32.totalorder %s740_s8, %s543_s28  ;;  %s548_s30 = sshll.u32 %s642_s29, 4  ;;  %s549_s30 = int_to_ptr.vmem [resolvable:$false] %s548_s30 }
  0x24   : > { %s550_s4 = scalar_lea.vmem %s549_s30, 512  ;;  %p551_p9 = scmp.lt.s32.totalorder %s740_s8, %s549_s30 }
  0x25   : > { %p546_p3 = pnand %p544_p1, %p530_p2  ;;  %p552_p4 = scmp.lt.s32.totalorder %s550_s4, %s543_s28 }
  0x27   : > { %p547_p11 = pneg %p546_p3  ;;  %p553_p6 = por %p552_p4, %p551_p9 }
  0x29   : > { %p554_p7 = pnand %p553_p6, %p547_p11 }
  0x2b   : > { %557 = shalt.err (!%p554_p7)
}
  0x2c   : > { %s643_s5 = smov 256   ;;  %s644_s7 = smov 128  }
  0x2d   : > { %s645_s11 = smov 8   ;;  %p442_p12 = scmp.ge.s32.totalorder %s640_s17, 1 }
  0x2e   : > { %458 = dma.hbm_to_vmem [thread:$0]  (!%p744_p0), %s738_s6, 256, %s740_s8, %s748_s10, %s643_s5, %s644_s7, %s645_s11  }
  0x2f   : > { %p183_p2 = scmp.lt.s32.totalorder %s640_s17, 3 }
  0x31   : > { %p184_p5 = pnand %p442_p12, %p183_p2 }
  0x32   : > { %s779_s18 = sand.u32 (!%p184_p5), 1, %s624_s13  }
  0x33   : > { %187 = sbr.rel (%p184_p5) target bundleno = 527 (0x20f), region = 32  ;;  %s443_s19 = sshll.u32 (!%p184_p5), %s779_s18, 4 }
  0x34   : > { %s190_s21 = scalar_lea.sflag (!%p184_p5), [#allocation4], %s779_s18  ;;  %s193_s22 = scalar_lea.vmem (!%p184_p5), [#allocation3], %s443_s19 }
  0x3a   : > { %611 = dma.done.wait (%p716_p8), %s190_s21, 256  }
  0x3b   : > { %613 = vsyncadd (%p716_p8), %s190_s21, 4294967040  ;;  %v646_v0 = vmov 0   ;;  %v238_v1 = vld [vmem:[%s860_s2] sm:$0xff]  ;;  %v239_v2 = vld [vmem:[%s860_s2 + $0x8] sm:$0xff]  ;;  %vm232_vm0 = vcmask 0   ;;  %v647_v3 = vmov 0.0   ;;  %v262_v20 = vlaneseq }
  0x3c   : > { %518 = vset.pattern.permute.xlu0 %v646_v0  ;;  %519 = vset.pattern.permute.xlu1 %v646_v0  ;;  %233 = vst.msk [vmem:[#allocation2] sm:$0x1] %vm232_vm0, %v647_v3  ;;  %v234_v4 = vld [vmem:[%s193_s22] sm:$0xff]  ;;  %v235_v5 = vld [vmem:[%s193_s22 + $0x8] sm:$0xff]  ;;  %p223_p8 = scmp.lt.s32.totalorder %s632_s15, 1  ;;  %vm309_vm7 = vcmask 1040384  }
  0x3d   : > { %283 = vperm.xlu0 %518, %v238_v1   ;;  %v240_v6 = vmax.f32 %v234_v4, %v235_v5  ;;  %v263_v22 = vshrl.u32 %v262_v20, 7  ;;  %s444_s4 = sshll.u32 %s779_s18, 3  ;;  %s448_s11 = sshll.u32 %s632_s15, 7 }
  0x3e   : > { %s224_s24 = scalar_select %p223_p8, %s632_s15, 1 }
  0x3f   : > { %v241_v7 = vrot.slane %v240_v6, 4  ;;  %v264_v24 = vadd.s32 8, %v263_v22  ;;  %s220_s5 = scalar_lea.vmem [#allocation6], %s444_s4  ;;  %s811_s22 = scalar_lea.hbm %s861_s3, %s448_s11 }
  0x40   : > { %s445_s23 = sshll.u32 %s224_s24, 1  ;;  %s345_s7 = sshll.u32 %s220_s5, 4  ;;  %s806_s7 = int_to_ptr.vmem [resolvable:$true] %s345_s7 }
  0x41   : > { %286 = vperm.xlu0 %518, %v239_v2   ;;  %v242_v8 = vmax.f32 %v240_v6, %v241_v7  ;;  %s799_s30 = scalar_lea.vmem %s859_s1, %s445_s23  ;;  %v324_v2 = vsub.s32 0, %v263_v22  ;;  %s332_s6 = scalar_lea.sflag [#allocation5], %s779_s18 }
  0x42   : > { %v446_v26 = vld [vmem:[%s799_s30] ss:$0 sm:$0xff]  ;;  %v237_v55 = vld [vmem:[%s799_s30 + $0x1] sm:$0x1]  ;;  %s558_s8 = scalar_lea.vmem %s806_s7, 128  ;;  %p868_p11 = scmp.ne.s32.totalorder %s865_s25, 0 }
  0x43   : > { %v243_v9 = vrot.slane %v242_v8, 2  ;;  %vm269_vm1 = vcmp.eq.s32.totalorder %v263_v22, %v446_v26  ;;  %vm270_vm2 = vcmp.eq.s32.totalorder %v264_v24, %v446_v26  ;;  %vm305_vm5 = vcmp.eq.s32.totalorder %v237_v55, 1  ;;  %v308_v63 = vld [vmem:[#allocation2] sm:$0x1]  ;;  %p559_p9 = scmp.ne.s32.totalorder %s806_s7, %s558_s8  ;;  %s648_s9 = smov [#allocation6]  }
  0x44   : > { %v271_v28 = vsel %vm269_vm1, %v234_v4, 0.0  ;;  %v272_v29 = vsel %vm270_vm2, %v235_v5, 0.0  ;;  %vm304_vm6 = vcmp.eq.s32.totalorder %v237_v55, 0  ;;  %s562_s15 = sshll.u32 %s648_s9, 4  ;;  %s563_s15 = int_to_ptr.vmem [resolvable:$false] %s562_s15 }
  0x45   : > { %v244_v10 = vmax.f32 %v242_v8, %v243_v9  ;;  %v273_v34 = vadd.f32 %v272_v29, %v271_v28  ;;  %p560_p0 = pnand %p559_p9, %p868_p11  ;;  %s564_s10 = scalar_lea.vmem %s563_s15, 256 }
  0x46   : > { %p565_p13 = scmp.lt.s32.totalorder %s806_s7, %s563_s15  ;;  %p566_p1 = scmp.lt.s32.totalorder %s564_s10, %s558_s8 }
  0x47   : > { %v245_v11 = vrot.slane %v244_v10, 1  ;;  %v274_v38 = vrot.slane %v273_v34, 4  ;;  %p561_p10 = pneg %p560_p0 }
  0x48   : > { %p567_p3 = por %p566_p1, %p565_p13 }
  0x49   : > { %v246_v12 = vmax.f32 %v244_v10, %v245_v11  ;;  %v275_v43 = vadd.f32 %v274_v38, %v273_v34 }
  0x4a   : > { %p568_p4 = pnand %p567_p3, %p561_p10 }
  0x4b   : > { %v248_v13 = vsub.f32 %v235_v5, %v246_v12  ;;  %v247_v14 = vsub.f32 %v234_v4, %v246_v12  ;;  %v276_v47 = vrot.slane %v275_v43, 2 }
  0x4d   : > { %v251_v15 = vmul.f32 1.442695, %v248_v13  ;;  %v249_v16 = vmul.f32 1.442695, %v247_v14  ;;  %v277_v49 = vadd.f32 %v276_v47, %v275_v43 }
  0x4f   : > { %520 = vpow2.f32 %v251_v15  ;;  %v278_v52 = vrot.slane %v277_v49, 1 }
  0x50   : > { %522 = vpow2.f32 %v249_v16 }
  0x51   : > { %v279_v53 = vadd.f32 %v278_v52, %v277_v49 }
  0x59   : > { %v521_v17 = vpop.eup %520 }
  0x5a   : > { %v523_v18 = vpop.eup %522 }
  0x5b   : > { %v253_v19 = vadd.f32 %v523_v18, %v521_v17 }
  0x5d   : > { %v254_v21 = vrot.slane %v253_v19, 4 }
  0x5f   : > { %v255_v23 = vadd.f32 %v254_v21, %v253_v19 }
  0x61   : > { %v256_v27 = vrot.slane %v255_v23, 2 }
  0x63   : > { %v257_v31 = vadd.f32 %v256_v27, %v255_v23 }
  0x65   : > { %v258_v36 = vrot.slane %v257_v31, 1 }
  0x67   : > { %v259_v40 = vadd.f32 %v258_v36, %v257_v31 }
  0x69   : > { %524 = vlog2.f32 %v259_v40  ;;  %v299_v45 = vmul.f32 1e-08, %v259_v40 }
  0x73   : > { %v525_v50 = vpop.eup %524 }
  0x74   : > { %v261_v51 = vmul.f32 0.6931472, %v525_v50 }
  0x76   : > { %v280_v54 = vadd.f32 %v261_v51, %v246_v12 }
  0x78   : > { %v281_v58 = vsub.f32 %v280_v54, %v279_v53 }
  0xbc   : > { %v284_v25 = vpop.permute.xlu0 %283 }
  0xbd   : > { %vm288_vm3 = vcmp.eq.s32.totalorder %v284_v25, %v446_v26 }
  0xbe   : > { %v290_v32 = vsel %vm288_vm3, %v523_v18, 0.0 }
  0xc0   : > { %v287_v30 = vpop.permute.xlu0 %286 }
  0xc1   : > { %vm289_vm4 = vcmp.eq.s32.totalorder %v287_v30, %v446_v26 }
  0xc2   : > { %v291_v33 = vsel %vm289_vm4, %v521_v17, 0.0 }
  0xc3   : > { %v292_v35 = vadd.f32 %v291_v33, %v290_v32 }
  0xc5   : > { %v293_v37 = vrot.slane %v292_v35, 4 }
  0xc7   : > { %v294_v39 = vadd.f32 %v293_v37, %v292_v35 }
  0xc9   : > { %v295_v41 = vrot.slane %v294_v39, 2 }
  0xcb   : > { %v296_v42 = vadd.f32 %v295_v41, %v294_v39 }
  0xcd   : > { %v297_v44 = vrot.slane %v296_v42, 1 }
  0xcf   : > { %v298_v46 = vadd.f32 %v297_v44, %v296_v42 }
  0xd1   : > { %v300_v48 = vadd.f32 %v299_v45, %v298_v46 }
  0xd3   : > { %526 = vlog2.f32 %v300_v48 }
  0xdd   : > { %v527_v56 = vpop.eup %526 }
  0xde   : > { %v302_v57 = vmul.f32 0.6931472, %v527_v56 }
  0xe0   : > { %v303_v59 = vsub.f32 %v261_v51, %v302_v57 }
  0xe2   : > { %v306_v60 = vsel %vm305_vm5, %v303_v59, 0.0 }
  0xe3   : > { %v307_v61 = vsel %vm304_vm6, %v281_v58, %v306_v60 }
  0xe4   : > { %v310_v62 = vsel %vm309_vm7, %v307_v61, 0.0 }
  0xe5   : > { %311 = vadd.xlane.f32.xlu1 %v310_v62 }
 0x172   : > { %v312_v0 = vpop.xlane.xlu1 %311 }
 0x173   : > { %v313_v1 = vadd.f32 %v312_v0, %v308_v63 }
 0x175   : > { %315 = vst.msk [vmem:[#allocation2] sm:$0x1] %vm232_vm0, %v313_v1 }
 0x17c   : > { %v319_v3 = vld [vmem:[#allocation2] sm:$0x1] }
 0x17d   : > { %v320_v4 = vmul.f32 0.125, %v319_v3 }
 0x17f   : > { %v325_v5 = vrot.slane %v320_v4, %v324_v2 }
 0x181   : > { %327 = vperm.xlu1 %519, %v325_v5  }
 0x200   : > { %v328_v6 = vpop.permute.xlu1 %327 }
 0x201   : > { %330 = vst [vmem:[%s220_s5] sm:$0xff] %v328_v6 }
 0x202   : > { %571 = shalt.err (!%p568_p4)
}
 0x203   : > { %s572_s18 = scalar_lea.hbm %s811_s22, 128  ;;  %s576_s28 = scalar_lea.hbm %s861_s3, 256 }
 0x204   : > { %p573_p6 = scmp.ne.s32.totalorder %s811_s22, %s572_s18  ;;  %p577_p2 = scmp.lt.u32.totalorder %s811_s22, %s861_s3 }
 0x205   : > { %p578_p5 = scmp.lt.u32.totalorder %s576_s28, %s572_s18  ;;  %p580_p9 = scmp.lt.u32.totalorder %s572_s18, %s811_s22 }
 0x206   : > { %p574_p7 = pnand %p573_p6, %p868_p11 }
 0x207   : > { %p579_p8 = por %p578_p5, %p577_p2 }
 0x208   : > { %p575_p12 = pneg %p574_p7 }
 0x209   : > { %p581_p0 = por %p580_p9, %p579_p8 }
 0x20b   : > { %p582_p10 = pnand %p581_p0, %p575_p12 }
 0x20d   : > { %585 = shalt.err (!%p582_p10)
}
 0x20e   : > { %453 = dma.vmem_to_hbm [thread:$0]  (%p868_p11), %s806_s7, 128, %s811_s22, %s332_s6  }
 0x20f PF: > { %s357_s4 = sand.u32 1, %s620_s12   ;;  %p869_p13 = scmp.ne.s32.totalorder %s866_s27, 0 }
 0x210   : > { %p870_p1 = scmp.ge.s32.totalorder %s640_s17, 2  ;;  %s358_s5 = scalar_lea.sflag [#allocation5], %s357_s4 }
 0x212   : > { %p460_p3 = pnand %p870_p1, %p869_p13 }
 0x214   : > { %615 = dma.done.wait (!%p460_p3), %s358_s5, 128  }
 0x215   : > { %617 = vsyncadd (!%p460_p3), %s358_s5, 4294967168  ;;  %s19_s17 = sadd.s32 1, %s640_s17   ;;  %s871_s12 = smov %s624_s13 }
 0x216   : > { %p16_p4 = scmp.ge.s32.totalorder %s19_s17, 4   ;;  %s872_s13 = smov %s628_s14 }
 0x217   : > { %s873_s14 = smov %s725_s26  ;;  %s874_s15 = smov %s636_s16 }
 0x218   : > { %s875_s16 = smov %s877_s20  ;;  %18 = sbr.rel (!%p16_p4) target bundleno = 6 (0x6), region = 88 }
 0x21f   :  { %363 = vsyncpa [#allocation4], 1 }
 0x220   :  { %365 = vsyncpa [#allocation4 + $0x1], 1 }
 0x221   :  { %366 = vsyncpa [#allocation5], 1 }
 0x222   :  { %368 = vsyncpa [#allocation5 + $0x1], 1 }

</bundles_post_ra>
